<compile_context>
chip_gen: v6e
topology: v6e:2x2x1
jax: 0.10.0
libtpu: 0.0.40
codegen_flags: <defaults>
</compile_context>

<pallas_src>
import functools

import jax
import jax.numpy as jnp
from jax.experimental import pallas as pl
from jax.experimental.pallas import tpu as pltpu


def _round_up(v, m):
    return (v + m - 1) // m * m


def _choose_tile_rows(total8, tile_rows, min_tiles=4):
    """Largest multiple-of-8 divisor of total8 that is <= tile_rows, preferring
    a grid of at least `min_tiles` steps (megacore-friendly on v7x)."""
    hi = min(tile_rows, total8)
    cands = [r for r in range(8, hi + 1, 8) if total8 % r == 0]
    pref = [r for r in cands if total8 // r >= min_tiles]
    return max(pref) if pref else max(cands)


def _vmem_budget_bytes(n, ed, r, chunk_n):
    """Generous VMEM footprint estimate (layout-padded), clamped to [32, 48] MiB."""
    lane = 128
    ed_p = _round_up(ed, lane)
    n_p = _round_up(max(n, 8), 8)
    c_p = _round_up(min(chunk_n, n_p), 8)
    table = n_p * ed_p * 4                      # resident f32 table, single copy
    ee = 8 * ed_p * 4                           # resident empty embedding
    idx_blk = 2 * r * lane * 4                  # double-buffered (r, 1) index tiles
    out_blk = 2 * r * ed_p * 4                  # double-buffered (r, ed) out tiles
    onehot = r * _round_up(c_p, lane) * 2       # (r, chunk) bf16 one-hot
    splits = 3 * c_p * ed_p * 2 + 2 * c_p * ed_p * 4   # bf16 chunks + f32 residuals
    acc = r * ed_p * 4
    need = table + ee + idx_blk + out_blk + onehot + splits + acc
    return int(min(max(need * 3 // 2 + (4 << 20), 32 << 20), 48 << 20))


def _make_gather_kernel(n_rows, chunk_n, split_f32):
    """Build the row-gather kernel for a table with `n_rows` rows.

    Kernel refs:
      idx_ref: (R, 1)   int32  gather indices (0 = empty embedding, i>=1 -> x[i-1])
      ee_ref:  (1, ed)         resident empty embedding (full array in VMEM)
      x_ref:   (N, ed)         resident embedding table (full array in VMEM)
      out_ref: (R, ed)         gathered rows
    """
    if n_rows <= chunk_n:
        n_full, rem = 0, n_rows          # single static dot covers the whole table
    else:
        n_full, rem = divmod(n_rows, chunk_n)

    def kernel(idx_ref, ee_ref, x_ref, out_ref):
        idx = idx_ref[...]                                   # (R, 1) int32
        rows = idx.shape[0]
        xidx = idx - 1                                       # row into x; -1 => empty

        # Index-0 rows take the empty embedding; out-of-range indices yield zeros.
        acc = (idx == 0).astype(jnp.float32) * ee_ref[...].astype(jnp.float32)

        def partial(start, size):
            col = jax.lax.broadcasted_iota(jnp.int32, (rows, size), 1)
            onehot = (col == (xidx - start)).astype(jnp.bfloat16)     # (R, size)
            ysub = x_ref[pl.ds(start, size), :]                       # (size, ed)
            if split_f32:
                # Exact f32 gather with 3 bf16 MXU passes: 0/1 weights are exact in
                # bf16 and y_hi + y_mid + y_lo reconstructs the f32 row bit-exactly.
                y_hi = ysub.astype(jnp.bfloat16)
                r1 = ysub - y_hi.astype(jnp.float32)
                y_mid = r1.astype(jnp.bfloat16)
                y_lo = (r1 - y_mid.astype(jnp.float32)).astype(jnp.bfloat16)
                p = jnp.dot(onehot, y_hi, preferred_element_type=jnp.float32)
                p = p + jnp.dot(onehot, y_mid, preferred_element_type=jnp.float32)
                p = p + jnp.dot(onehot, y_lo, preferred_element_type=jnp.float32)
            else:
                p = jnp.dot(onehot.astype(ysub.dtype), ysub,
                            preferred_element_type=jnp.float32)
            return p

        if n_full > 0:
            def body(c, a):
                start = pl.multiple_of(c * chunk_n, chunk_n)
                return a + partial(start, chunk_n)
            acc = jax.lax.fori_loop(0, n_full, body, acc)
        if rem > 0:
            acc = acc + partial(n_full * chunk_n, rem)

        out_ref[...] = acc.astype(out_ref.dtype)

    return kernel


def block_shaper(empty_embedding, x, gi, nb, *, tile_rows=512, chunk_n=512):
    """BlockShaper forward.

    empty_embedding: (1, ed)
    x:               (N, ed)
    gi:              (B, nb**3) int, values in [0, N] (0 selects the empty embedding)
    returns          (B, nb, nb, nb, ed) in x.dtype
    """
    n, ed = x.shape
    assert empty_embedding.shape == (1, ed), empty_embedding.shape
    batch, length = gi.shape
    assert length == nb ** 3, (length, nb)

    out_dtype = x.dtype
    split_f32 = jnp.dtype(out_dtype) == jnp.dtype(jnp.float32)

    idx = gi.astype(jnp.int32).reshape(-1)
    total = batch * length
    padded_total = _round_up(total, 8)
    if padded_total != total:
        # Padded rows gather index 0 (empty embedding) and are sliced off below.
        idx = jnp.pad(idx, (0, padded_total - total))
    idx2d = idx.reshape(padded_total, 1)

    r = _choose_tile_rows(padded_total, tile_rows)
    n_tiles = padded_total // r

    kernel = _make_gather_kernel(n, chunk_n, split_f32)
    vmem_limit = _vmem_budget_bytes(n, ed, r, chunk_n)

    out = pl.pallas_call(
        kernel,
        out_shape=jax.ShapeDtypeStruct((padded_total, ed), out_dtype),
        grid_spec=pltpu.PrefetchScalarGridSpec(
            num_scalar_prefetch=0,
            grid=(n_tiles,),
            in_specs=[
                pl.BlockSpec((r, 1), lambda t: (t, 0)),                    # index tile
                pl.BlockSpec(memory_space=pltpu.MemorySpace.VMEM),         # ee, resident
                pl.BlockSpec(memory_space=pltpu.MemorySpace.VMEM),         # table, resident
            ],
            out_specs=pl.BlockSpec((r, ed), lambda t: (t, 0)),
        ),
        compiler_params=pltpu.CompilerParams(
            dimension_semantics=("parallel",),   # independent row tiles
            vmem_limit_bytes=vmem_limit,
        ),
    )(idx2d, empty_embedding, x)

    if padded_total != total:
        out = out[:total]
    return out.reshape(batch, nb, nb, nb, ed)


def _reference(empty_embedding, x, gi, nb):
    table = jnp.concatenate([empty_embedding.astype(x.dtype), x], axis=0)
    batch = gi.shape[0]
    return table[gi].reshape(batch, nb, nb, nb, -1)


if __name__ == "__main__":
    key = jax.random.PRNGKey(0)
    ed, nb = 32, 4          # embed dim, block grid size -> L = nb**3 = 64
    n_in = 20               # rows of x (before the implicit empty-embedding row)
    batch = 2
    length = nb ** 3

    k_ee, k_x, k_gi = jax.random.split(key, 3)
    # xavier_uniform init for the (1, ed) empty embedding.
    lim = (6.0 / (1 + ed)) ** 0.5
    ee = jax.random.uniform(k_ee, (1, ed), jnp.float32, -lim, lim)
    x = jax.random.normal(k_x, (n_in, ed), dtype=jnp.float32)
    gi = jax.random.randint(k_gi, (batch, length), 0, n_in + 1, dtype=jnp.int32)

    fn = jax.jit(functools.partial(block_shaper, nb=nb))
    out = jax.block_until_ready(fn(ee, x, gi))

    ref = _reference(ee, x, gi, nb)
    assert out.shape == (batch, nb, nb, nb, ed), out.shape
    assert jnp.allclose(out, ref, atol=1e-5, rtol=1e-5), float(jnp.max(jnp.abs(out - ref)))

    print("KERNEL_OK")
</pallas_src>

<mosaic_0001>
module attributes {stable_mosaic.version = 11 : i64} {
  func.func @kernel(%arg0: i32, %arg1: memref<32x1xi32, #tpu.memory_space<vmem>>, %arg2: memref<1x32xf32, #tpu.memory_space<vmem>>, %arg3: memref<20x32xf32, #tpu.memory_space<vmem>>, %arg4: memref<32x32xf32, #tpu.memory_space<vmem>>) attributes {dimension_semantics = [#tpu.dimension_semantics<parallel>], iteration_bounds = array<i64: 4>, scalar_prefetch = 0 : i64, scratch_operands = 0 : i64, tpu.core_type = #tpu.core_type<tc>, window_params = [{transform_indices = @transform_0, window_bounds = array<i64: 32, 1>}, {pipeline_mode = #tpu.pipeline_mode<synchronous>, transform_indices = @transform_1, window_bounds = array<i64: 1, 32>}, {pipeline_mode = #tpu.pipeline_mode<synchronous>, transform_indices = @transform_2, window_bounds = array<i64: 20, 32>}, {transform_indices = @transform_3, window_bounds = array<i64: 32, 32>}]} {
    %c0 = arith.constant 0 : index
    %c0_0 = arith.constant 0 : index
    %0 = vector.load %arg1[%c0, %c0_0] : memref<32x1xi32, #tpu.memory_space<vmem>>, vector<32x1xi32>
    %c1_i32 = arith.constant 1 : i32
    %1 = vector.broadcast %c1_i32 : i32 to vector<32x1xi32>
    %2 = arith.subi %0, %1 : vector<32x1xi32>
    %c0_i32 = arith.constant 0 : i32
    %3 = vector.broadcast %c0_i32 : i32 to vector<32x1xi32>
    %4 = arith.cmpi eq, %0, %3 : vector<32x1xi32>
    %5 = arith.extui %4 : vector<32x1xi1> to vector<32x1xi32>
    %6 = arith.sitofp %5 : vector<32x1xi32> to vector<32x1xf32>
    %c0_1 = arith.constant 0 : index
    %c0_2 = arith.constant 0 : index
    %7 = vector.load %arg2[%c0_1, %c0_2] : memref<1x32xf32, #tpu.memory_space<vmem>>, vector<1x32xf32>
    %8 = vector.broadcast %6 : vector<32x1xf32> to vector<32x32xf32>
    %9 = vector.broadcast %7 : vector<1x32xf32> to vector<32x32xf32>
    %10 = arith.mulf %8, %9 : vector<32x32xf32>
    %11 = tpu.iota {dimensions = array<i32: 1>} : vector<32x20xi32>
    %c0_i32_3 = arith.constant 0 : i32
    %12 = vector.broadcast %c0_i32_3 : i32 to vector<32x1xi32>
    %13 = arith.subi %2, %12 : vector<32x1xi32>
    %14 = vector.broadcast %13 : vector<32x1xi32> to vector<32x20xi32>
    %15 = arith.cmpi eq, %11, %14 : vector<32x20xi32>
    %16 = arith.extui %15 : vector<32x20xi1> to vector<32x20xi32>
    %17 = arith.sitofp %16 : vector<32x20xi32> to vector<32x20xf32>
    %18 = arith.truncf %17 : vector<32x20xf32> to vector<32x20xbf16>
    %c0_4 = arith.constant 0 : index
    %c0_5 = arith.constant 0 : index
    %19 = vector.load %arg3[%c0_4, %c0_5] : memref<20x32xf32, #tpu.memory_space<vmem>>, vector<20x32xf32>
    %20 = arith.truncf %19 : vector<20x32xf32> to vector<20x32xbf16>
    %21 = arith.extf %20 : vector<20x32xbf16> to vector<20x32xf32>
    %22 = arith.subf %19, %21 : vector<20x32xf32>
    %23 = arith.truncf %22 : vector<20x32xf32> to vector<20x32xbf16>
    %24 = arith.extf %23 : vector<20x32xbf16> to vector<20x32xf32>
    %25 = arith.subf %22, %24 : vector<20x32xf32>
    %26 = arith.truncf %25 : vector<20x32xf32> to vector<20x32xbf16>
    %cst = arith.constant dense<0.000000e+00> : vector<32x32xf32>
    %27 = tpu.matmul %18, %20, %cst {dimension_numbers = #tpu.dot_dimension_numbers<[1], [0], [0], [1], [0, 0, 1, 1], [], []>} : vector<32x20xbf16>, vector<20x32xbf16>, vector<32x32xf32> -> vector<32x32xf32>
    %cst_6 = arith.constant dense<0.000000e+00> : vector<32x32xf32>
    %28 = tpu.matmul %18, %23, %cst_6 {dimension_numbers = #tpu.dot_dimension_numbers<[1], [0], [0], [1], [0, 0, 1, 1], [], []>} : vector<32x20xbf16>, vector<20x32xbf16>, vector<32x32xf32> -> vector<32x32xf32>
    %29 = arith.addf %27, %28 : vector<32x32xf32>
    %cst_7 = arith.constant dense<0.000000e+00> : vector<32x32xf32>
    %30 = tpu.matmul %18, %26, %cst_7 {dimension_numbers = #tpu.dot_dimension_numbers<[1], [0], [0], [1], [0, 0, 1, 1], [], []>} : vector<32x20xbf16>, vector<20x32xbf16>, vector<32x32xf32> -> vector<32x32xf32>
    %31 = arith.addf %29, %30 : vector<32x32xf32>
    %32 = arith.addf %10, %31 : vector<32x32xf32>
    %c0_8 = arith.constant 0 : index
    %c0_9 = arith.constant 0 : index
    %33 = vector.load %arg4[%c0_8, %c0_9] : memref<32x32xf32, #tpu.memory_space<vmem>>, vector<32x32xf32>
    tpu.vector_store %arg4[%c0_8, %c0_9], %32 {strides = array<i32>} : memref<32x32xf32, #tpu.memory_space<vmem>>, vector<32x32xf32>,
    return
  }
  func.func @transform_0(%arg0: i32) -> (i32, i32) {
    %c0_i32 = arith.constant 0 : i32
    %c0_i32_0 = arith.constant 0 : i32
    return %arg0, %c0_i32 : i32, i32
  }
  func.func @transform_1(%arg0: i32) -> (i32, i32) {
    %c0_i32 = arith.constant 0 : i32
    %c0_i32_0 = arith.constant 0 : i32
    %c0_i32_1 = arith.constant 0 : i32
    return %c0_i32, %c0_i32_0 : i32, i32
  }
  func.func @transform_2(%arg0: i32) -> (i32, i32) {
    %c0_i32 = arith.constant 0 : i32
    %c0_i32_0 = arith.constant 0 : i32
    %c0_i32_1 = arith.constant 0 : i32
    return %c0_i32, %c0_i32_0 : i32, i32
  }
  func.func @transform_3(%arg0: i32) -> (i32, i32) {
    %c0_i32 = arith.constant 0 : i32
    %c0_i32_0 = arith.constant 0 : i32
    return %arg0, %c0_i32 : i32, i32
  }
}

</mosaic_0001>

<bundles_post_ra>
// kernel: block_shaper.1
= control target key start
LH: loop header
LB: loop body
LE: loop exit
PB: predicated region body
PF: predicated region fallthrough
CT: control target
= control target key end

     0   :  { %8 = vsyncpa [#allocation3], 0  ;;  %s866_s0 = inlined_call_operand.vmem [shape: s32[128,1], index: 0, kind: input, shape index: {}]   ;;  %s867_s1 = inlined_call_operand.vmem [shape: f32[1,32], index: 1, kind: input, shape index: {}]   ;;  %s868_s2 = inlined_call_operand.vmem [shape: f32[20,32], index: 2, kind: input, shape index: {}]   ;;  %s869_s3 = inlined_call_operand.hbm [shape: f32[128,32], index: 3, kind: output, shape index: {}]  }
   0x1   :  { %10 = vsyncpa [#allocation3 + $0x1], 0  ;;  %s739_s12 = smov 0   ;;  %s741_s13 = smov 0  }
   0x2   :  { %s743_s14 = smov 0   ;;  %s745_s15 = smov 0  }
   0x3 LB: > { %s760_s16 = sadd.s32 4294967295, %s712_s15   ;;  %s526_s17 = sadd.s32 4294967294, %s712_s15   ;;  %s712_s15 = sphi %s745_s15, %s875_s15   ;;  %s708_s14 = sphi %s743_s14, %s874_s14   ;;  %s704_s13 = sphi %s741_s13, %s873_s13   ;;  %s700_s12 = sphi %s739_s12, %s872_s12  }
   0x4   : > { %s764_s18 = sadd.s32 1, %s712_s15   ;;  %s91_s19 = sadd.s32 1, %s708_s14 }
   0x5   : > { %s88_s20 = ssub.s32 %s712_s15, %s764_s18  ;;  %p101_p0 = scmp.ne.s32.totalorder %s708_s14, %s704_s13 }
   0x6   : > { %p89_p1 = scmp.eq.s32.totalorder %s88_s20, 0  ;;  %p102_p2 = scmp.eq.s32.totalorder %s760_s16, 3 }
   0x7   : > { %p107_p3 = scmp.ne.s32.totalorder %s704_s13, %s700_s12  ;;  %p108_p4 = scmp.eq.s32.totalorder %s526_s17, 3 }
   0x8   : > { %s775_s21 = scalar_select %p89_p1, %s708_s14, %s91_s19  }
   0x9   : > { %p777_p5 = por %p102_p2, %p101_p0  ;;  %p781_p6 = por %p108_p4, %p107_p3 }
   0xa   : > { %p529_p7 = scmp.ge.s32.totalorder %s712_s15, 1  ;;  %p141_p8 = scmp.lt.s32.totalorder %s712_s15, 5 }
   0xc   : > { %p142_p9 = pnand %p529_p7, %p141_p8 }
   0xd   : > { %s531_s24 = sshll.u32 (!%p142_p9), %s760_s16, 2  ;;  %s162_s8 = sand.u32 (!%p142_p9), 1, %s704_s13  }
   0xe   : > { %145 = sbr.rel (%p142_p9) target bundleno = 384 (0x180), region = 32  ;;  %p166_p10 = scmp.lt.s32.totalorder (!%p142_p9), %s531_s24, 15 }
   0xf   : > { %s530_s11 = sshll.u32 (!%p142_p9), %s162_s8, 5  ;;  %s557_s20 = sshll.u32 (!%p142_p9), %s760_s16, 9 }
  0x10   : > { %s164_s17 = scalar_lea.vmem (!%p142_p9), [#allocation2], %s530_s11  ;;  %s818_s26 = scalar_lea.hbm (!%p142_p9), %s869_s3, %s557_s20 }
  0x11   : > { %s464_s19 = sshll.u32 (!%p142_p9), %s164_s17, 4  ;;  %s826_s16 = scalar_lea.sflag (!%p142_p9), [#allocation3], %s162_s8  ;;  %s820_s19 = int_to_ptr.vmem [resolvable:$true] %s464_s19 }
  0x12   : > { %s652_s27 = scalar_lea.vmem (!%p142_p9), %s820_s19, 512  ;;  %s716_s28 = smov (!%p142_p9), [#allocation2]  }
  0x13   : > { %v254_v0 = vld [vmem:[%s868_s2 + $0x10] sm:$0xf]  ;;  %v714_v1 = vmov 0   ;;  %v252_v3 = vld [vmem:[%s868_s2] sm:$0xff]  ;;  %v253_v4 = vld [vmem:[%s868_s2 + $0x8] sm:$0xff]  ;;  %s877_s24 = smov (!%p166_p10, %s531_s24), 15  ;;  %v224_v40 = vlaneseq  ;;  %p653_p11 = scmp.ne.s32.totalorder %s820_s19, %s652_s27 }
  0x14   : > { %641 = vset.pattern.permute.xlu1 %v714_v1  ;;  %640 = vset.pattern.permute.xlu0 %v714_v1  ;;  %v256_v2 = vpack.c.bf16 %v254_v0, %v254_v0  ;;  %v255_v6 = vpack.c.bf16 %v253_v4, %v252_v3  ;;  %s532_s4 = sshll.u32 %s877_s24, 3  ;;  %vm280_vm0 = vcmask 1041408   ;;  %v715_v20 = vmov 0.0   ;;  %v541_v60 = vld [vmem:[%s867_s1] ss:$0 sm:$0xff]  ;;  %s656_s29 = sshll.u32 %s716_s28, 4  ;;  %s657_s29 = int_to_ptr.vmem [resolvable:$false] %s656_s29 }
  0x15   : > { %s169_s7 = scalar_lea.vmem %s866_s0, %s532_s4  ;;  %v225_v41 = vand.u32 127, %v224_v40  ;;  %vm273_vm9 = vcmask 162816   ;;  %vm445_vm10 = vcmask 261120   ;;  %p654_p12 = pnand %p653_p11, %p777_p5 }
  0x16   : > { %v259_v5 = vunpack.c.l.bf16 %v256_v2  ;;  %v257_v8 = vunpack.c.l.bf16 %v255_v6  ;;  %v258_v9 = vunpack.c.h.bf16 %v255_v6  ;;  %v175_v10 = vld [vmem:[%s169_s7 + $0x10] sm:$0xff]  ;;  %v173_v11 = vld [vmem:[%s169_s7] sm:$0xff]  ;;  %v176_v12 = vld [vmem:[%s169_s7 + $0x18] sm:$0xff]  ;;  %595 = vmatprep.subr.msk.bf16.mxu1 %vm280_vm0, %v256_v2  ;;  %v334_v14 = vsel %vm280_vm0, %v256_v2, 0  ;;  %s658_s30 = scalar_lea.vmem %s657_s29, 1024  ;;  %p659_p0 = scmp.lt.s32.totalorder %s820_s19, %s657_s29 }
  0x17   : > { %v535_v17 = vadd.s32 4294967295, %v175_v10  ;;  %vm183_vm1 = vcmp.eq.s32.totalorder %v175_v10, 0  ;;  %v533_v18 = vadd.s32 4294967295, %v173_v11  ;;  %vm181_vm2 = vcmp.eq.s32.totalorder %v173_v11, 0  ;;  %v174_v19 = vld [vmem:[%s169_s7 + $0x8] sm:$0xff]  ;;  %579 = vmatpush3.bf16.msra.mxu1 %v334_v14  ;;  %p655_p13 = pneg %p654_p12  ;;  %p660_p1 = scmp.lt.s32.totalorder %s658_s30, %s652_s27 }
  0x18   : > { %v262_v7 = vsub.f32 %v254_v0, %v259_v5  ;;  %v260_v15 = vsub.f32 %v252_v3, %v257_v8  ;;  %v261_v16 = vsub.f32 %v253_v4, %v258_v9  ;;  %v539_v21 = vsel %vm183_vm1, 1.0, %v715_v20  ;;  %580 = vmatprep.subr.bf16.mxu1 %v255_v6 }
  0x19   : > { %v536_v22 = vadd.s32 4294967295, %v176_v12  ;;  %v534_v23 = vadd.s32 4294967295, %v174_v19  ;;  %233 = vperm.xlu1 %641, %v535_v17   ;;  %227 = vperm.xlu0 %640, %v533_v18   ;;  %vm184_vm3 = vcmp.eq.s32.totalorder %v176_v12, 0  ;;  %vm182_vm4 = vcmp.eq.s32.totalorder %v174_v19, 0  ;;  %p661_p2 = por %p660_p1, %p659_p0 }
  0x1a   : > { %v264_v13 = vpack.c.bf16 %v262_v7, %v262_v7  ;;  %v537_v26 = vsel %vm181_vm2, 1.0, %v715_v20  ;;  %v540_v27 = vsel %vm184_vm3, 1.0, %v715_v20  ;;  %v538_v28 = vsel %vm182_vm4, 1.0, %v715_v20 }
  0x1b   : > { %v263_v29 = vpack.c.bf16 %v261_v16, %v260_v15  ;;  %581 = vmatpush3.bf16.msra.mxu1 %v255_v6  ;;  %v647_v31 = vpack.i.bf16 %v540_v27, %v539_v21  ;;  %v642_v32 = vpack.i.bf16 %v538_v28, %v537_v26  ;;  %p662_p3 = pnand %p661_p2, %p655_p13 }
  0x1c   : > { %594 = vmatprep.subr.msk.bf16.mxu0 %vm280_vm0, %v264_v13  ;;  %v267_v24 = vunpack.c.l.bf16 %v264_v13  ;;  %v282_v25 = vsel %vm280_vm0, %v264_v13, 0 }
  0x1d   : > { %571 = vmatpush3.bf16.msra.mxu0 %v282_v25  ;;  %236 = vperm.xlu1 %641, %v536_v22   ;;  %v265_v34 = vunpack.c.l.bf16 %v263_v29  ;;  %v266_v35 = vunpack.c.h.bf16 %v263_v29 }
  0x1e   : > { %v270_v30 = vsub.f32 %v262_v7, %v267_v24  ;;  %572 = vmatprep.subr.bf16.mxu0 %v263_v29  ;;  %230 = vperm.xlu0 %640, %v534_v23  }
  0x1f   : > { %v268_v37 = vsub.f32 %v260_v15, %v265_v34  ;;  %v269_v38 = vsub.f32 %v261_v16, %v266_v35 }
  0x20   : > { %v272_v33 = vpack.c.bf16 %v270_v30, %v270_v30 }
  0x21   : > { %573 = vmatpush3.bf16.msra.mxu0 %v263_v29  ;;  %648 = vperm.xlu1 %641, %v647_v31   ;;  %v271_v39 = vpack.c.bf16 %v269_v38, %v268_v37 }
  0x22   : > { %596 = vmatprep.subr.msk.bf16.mxu0 %vm280_vm0, %v272_v33  ;;  %v386_v36 = vsel %vm280_vm0, %v272_v33, 0  ;;  %643 = vperm.xlu0 %640, %v642_v32  }
  0x94   : > { %v234_v42 = vpop.permute.xlu1 %233  ;;  %v228_v43 = vpop.permute.xlu0 %227 }
  0x95   : > { %vm240_vm5 = vcmp.eq.s32.totalorder %v225_v41, %v234_v42  ;;  %vm238_vm6 = vcmp.eq.s32.totalorder %v225_v41, %v228_v43 }
  0x96   : > { %v544_v46 = vsel %vm240_vm5, 1.0, %v715_v20  ;;  %v542_v47 = vsel %vm238_vm6, 1.0, %v715_v20 }
  0x98   : > { %v237_v44 = vpop.permute.xlu1 %236 }
  0x99   : > { %v231_v45 = vpop.permute.xlu0 %230  ;;  %vm241_vm7 = vcmp.eq.s32.totalorder %v225_v41, %v237_v44 }
  0x9a   : > { %vm239_vm8 = vcmp.eq.s32.totalorder %v225_v41, %v231_v45  ;;  %v545_v48 = vsel %vm241_vm7, 1.0, %v715_v20 }
  0x9b   : > { %v543_v49 = vsel %vm239_vm8, 1.0, %v715_v20  ;;  %v251_v50 = vpack.c.bf16 %v545_v48, %v544_v46 }
  0x9c   : > { %v250_v51 = vpack.c.bf16 %v543_v49, %v542_v47  ;;  %v649_v54 = vpop.permute.xlu1 %648 }
  0x9d   : > { %v644_v57 = vpop.permute.xlu0 %643  ;;  %v650_v59 = vunpack.i.l.bf16 %v649_v54  ;;  %v651_v2 = vunpack.i.h.bf16 %v649_v54 }
  0x9e   : > { %574 = vmatprep.mubr.msk.bf16.mxu0 %vm273_vm9, %v250_v51  ;;  %582 = vmatprep.mubr.msk.bf16.mxu1 %vm273_vm9, %v250_v51  ;;  %v645_v63 = vunpack.i.l.bf16 %v644_v57  ;;  %v646_v6 = vunpack.i.h.bf16 %v644_v57 }
  0x9f   : > { %575 = vmatmul.mubr.msk.bf16.vlgmr.msra.gmra.mxu0 %vm273_vm9, %v251_v50  ;;  %583 = vmatmul.mubr.msk.bf16.vlgmr.msra.gmra.mxu1 %vm273_vm9, %v251_v50  ;;  %v222_v3 = vmul.f32 %v650_v59, %v541_v60  ;;  %v223_v14 = vmul.f32 %v651_v2, %v541_v60 }
  0xa0   : > { %587 = vmatpush3.bf16.msra.mxu0 %v386_v36  ;;  %590 = vmatprep.mubr.msk.bf16.mxu0 %vm273_vm9, %v250_v51  ;;  %v220_v9 = vmul.f32 %v645_v63, %v541_v60  ;;  %v221_v19 = vmul.f32 %v646_v6, %v541_v60 }
  0xa1   : > { %588 = vmatprep.subr.bf16.mxu0 %v271_v39 }
  0xa4   : > { %589 = vmatpush3.bf16.msra.mxu0 %v271_v39 }
  0xa7   : > { %591 = vmatmul.mubr.msk.bf16.vlgmr.msra.gmra.mxu0 %vm273_vm9, %v251_v50 }
 0x15f   : > { %v576_v52 = vpop.f32.mrf.mxu0  ;;  %v584_v53 = vpop.f32.mrf.mxu1 }
 0x160   : > { %v379_v0 = vadd.f32 %v584_v53, %v576_v52 }
 0x161   : > { %v318_v55 = vpop.f32.mrf.mxu0  ;;  %v370_v56 = vpop.f32.mrf.mxu1 }
 0x162   : > { %v371_v4 = vadd.f32 %v370_v56, %v318_v55 }
 0x163   : > { %v577_v58 = vpop.f32.mrf.mxu0  ;;  %v585_v61 = vpop.f32.mrf.mxu1 }
 0x164   : > { %v382_v10 = vadd.f32 %v585_v61, %v577_v58 }
 0x165   : > { %v321_v62 = vpop.f32.mrf.mxu0  ;;  %v373_v7 = vpop.f32.mrf.mxu1 }
 0x166   : > { %v374_v15 = vadd.f32 %v373_v7, %v321_v62 }
 0x167   : > { %v592_v1 = vpop.f32.mrf.mxu0 }
 0x168   : > { %v439_v5 = vadd.f32 %v592_v1, %v379_v0 }
 0x169   : > { %v422_v8 = vpop.f32.mrf.mxu0 }
 0x16a   : > { %v443_v11 = vadd.f32 %v439_v5, %v222_v3  ;;  %v437_v12 = vadd.f32 %v422_v8, %v371_v4 }
 0x16b   : > { %v593_v13 = vpop.f32.mrf.mxu0 }
 0x16c   : > { %448 = vst.msk [vmem:[%s164_s17 + $0x10] sm:$0xff] %vm445_vm10, %v443_v11  ;;  %v441_v16 = vadd.f32 %v437_v12, %v220_v9  ;;  %v440_v17 = vadd.f32 %v593_v13, %v382_v10 }
 0x16d   : > { %v425_v18 = vpop.f32.mrf.mxu0 }
 0x16e   : > { %446 = vst.msk [vmem:[%s164_s17] sm:$0xff] %vm445_vm10, %v441_v16  ;;  %v444_v20 = vadd.f32 %v440_v17, %v223_v14  ;;  %v438_v21 = vadd.f32 %v425_v18, %v374_v15 }
 0x170   : > { %449 = vst.msk [vmem:[%s164_s17 + $0x18] sm:$0xff] %vm445_vm10, %v444_v20  ;;  %v442_v22 = vadd.f32 %v438_v21, %v221_v19 }
 0x172   : > { %447 = vst.msk [vmem:[%s164_s17 + $0x8] sm:$0xff] %vm445_vm10, %v442_v22 }
 0x173   : > { %665 = shalt.err (!%p662_p3)
}
 0x174   : > { %s666_s4 = scalar_lea.hbm %s818_s26, 512  ;;  %s670_s7 = scalar_lea.hbm %s869_s3, 2048 }
 0x175   : > { %p667_p4 = scmp.ne.s32.totalorder %s818_s26, %s666_s4  ;;  %p671_p9 = scmp.lt.s32.totalorder %s818_s26, %s869_s3 }
 0x176   : > { %p672_p10 = scmp.lt.s32.totalorder %s670_s7, %s666_s4 }
 0x177   : > { %p668_p7 = pnand %p667_p4, %p777_p5 }
 0x178   : > { %p673_p11 = por %p672_p10, %p671_p9 }
 0x179   : > { %p669_p8 = pneg %p668_p7 }
 0x17b   : > { %p674_p12 = pnand %p673_p11, %p669_p8 }
 0x17d   : > { %677 = shalt.err (!%p674_p12)
}
 0x17e   : > { %s717_s10 = smov 128   ;;  %s718_s11 = smov 8  }
 0x17f   : > { %597 = dma.vmem_to_hbm [thread:$0]  (%p777_p5), %s820_s19, 512, %s818_s26, %s826_s16, %s717_s10, %s717_s10, %s718_s11  }
 0x180 PF: > { %p603_p13 = scmp.ge.s32.totalorder %s712_s15, 2  ;;  %s479_s17 = sand.u32 1, %s700_s12  }
 0x181   : > { %s480_s20 = scalar_lea.sflag [#allocation3], %s479_s17 }
 0x182   : > { %p600_p0 = pnand %p603_p13, %p781_p6 }
 0x184   : > { %p601_p1 = pneg %p600_p0 }
 0x186   : > { %695 = dma.done.wait (%p601_p1), %s480_s20, 512  }
 0x187   : > { %697 = vsyncadd (%p601_p1), %s480_s20, 4294966784  ;;  %p13_p2 = scmp.ge.s32.totalorder %s764_s18, 6   ;;  %s872_s12 = smov %s704_s13 }
 0x188   : > { %s873_s13 = smov %s708_s14  ;;  %s874_s14 = smov %s775_s21 }
 0x189   : > { %s875_s15 = smov %s764_s18  ;;  %15 = sbr.rel (!%p13_p2) target bundleno = 3 (0x3), region = 67 }
 0x18e   :  { %485 = vsyncpa [#allocation3], 1 }
 0x18f   :  { %487 = vsyncpa [#allocation3 + $0x1], 1 }

</bundles_post_ra>
